<compile_context>
chip_gen: v7x
topology: tpu7x:2x2x1
jax: 0.10.0
libtpu: 0.0.40
codegen_flags: <defaults>
</compile_context>

<pallas_src>
import numpy as np

import jax
import jax.numpy as jnp
from jax.experimental import pallas as pl
from jax.experimental.pallas import tpu as pltpu


def _round_up(x, m):
    return ((x + m - 1) // m) * m


# ---------------------------------------------------------------------------
# Plain-JAX glue: FPS / kNN / gather / polar  (matches sample_and_group)
# ---------------------------------------------------------------------------
def _xyz2sphere(xyz):
    # xyz2sphere(..., normalize=True): [rho, theta/pi, phi/(2*pi)+0.5]
    rho = jnp.sqrt(jnp.sum(xyz * xyz, axis=-1, keepdims=True))
    rho = jnp.maximum(rho, 0.0)
    safe_rho = jnp.where(rho == 0.0, 1.0, rho)
    theta = jnp.arccos(jnp.clip(xyz[..., 2:3] / safe_rho, -1.0, 1.0))
    theta = jnp.where(rho == 0.0, 0.0, theta)
    phi = jnp.arctan2(xyz[..., 1:2], xyz[..., 0:1])
    return jnp.concatenate([rho, theta / np.pi, phi / (2.0 * np.pi) + 0.5], axis=-1)


def _fps_segment(points, m):
    # TODO(synk): pointops.furthestsampling / sectorized_fps (CUDA) have no
    # Pallas equivalent; deterministic plain-JAX FPS per segment instead.
    n = points.shape[0]

    def body(i, state):
        dist, idxs = state
        last = points[idxs[i - 1]]
        d = jnp.sum((points - last) ** 2, axis=-1)
        dist = jnp.minimum(dist, d)
        idxs = idxs.at[i].set(jnp.argmax(dist).astype(jnp.int32))
        return dist, idxs

    dist0 = jnp.full((n,), jnp.inf, jnp.float32)
    idxs0 = jnp.zeros((m,), jnp.int32)
    _, idxs = jax.lax.fori_loop(1, m, body, (dist0, idxs0))
    return idxs


def _furthest_point_sample(center, offset_np, stride):
    idx_parts, new_offsets = [], []
    start, total = 0, 0
    for end in offset_np:
        end = int(end)
        m = max((end - start) // stride, 1)
        seg_idx = _fps_segment(center[start:end], m) + start
        idx_parts.append(seg_idx)
        total += m
        new_offsets.append(total)
        start = end
    return jnp.concatenate(idx_parts), np.array(new_offsets, dtype=np.int32)


def _knn_query(nsample, xyz, new_xyz, offset_np, new_offset_np):
    # TODO(synk): pointops.knnquery (CUDA) has no Pallas equivalent; dense
    # masked pairwise-distance top_k (fine at demo scale).
    n, m = xyz.shape[0], new_xyz.shape[0]
    sid = jnp.searchsorted(jnp.asarray(offset_np), jnp.arange(n), side="right")
    qid = jnp.searchsorted(jnp.asarray(new_offset_np), jnp.arange(m), side="right")
    d2 = jnp.sum((new_xyz[:, None, :] - xyz[None, :, :]) ** 2, axis=-1)
    d2 = jnp.where(qid[:, None] == sid[None, :], d2, jnp.inf)
    _, idx = jax.lax.top_k(-d2, nsample)
    return idx


def _sample_and_group(stride, nsample, center, normal, feature, offset_np,
                      return_polar):
    if stride > 1:
        fps_idx, new_offset_np = _furthest_point_sample(center, offset_np, stride)
        new_center = center[fps_idx]
        new_normal = normal[fps_idx]
    else:
        new_center, new_normal = center, normal
        new_offset_np = np.asarray(offset_np, dtype=np.int32)

    idx = _knn_query(nsample, center, new_center, offset_np, new_offset_np)
    group_center = center[idx]                                  # [M, ns, 3]
    group_normal = normal[idx]                                  # [M, ns, D]
    group_center_norm = group_center - new_center[:, None, :]   # [M, ns, 3]

    if return_polar:
        polar = _xyz2sphere(group_center_norm)                  # glue: acos/atan2
        pos_part = jnp.concatenate([group_center_norm, polar], axis=-1)
    else:
        pos_part = group_center_norm

    if feature is not None:
        group_feature = feature[idx]
        parts = [pos_part, group_normal, group_feature]
    else:
        parts = [pos_part, group_normal]
    grouped = jnp.concatenate(parts, axis=-1)                   # [M, ns, C_total]
    return new_center, new_normal, new_offset_np, grouped


# ---------------------------------------------------------------------------
# Parameters (Conv1d + BatchNorm1d, eval mode) and BN folding
# ---------------------------------------------------------------------------
def init_params(key, pos_channel, feat_channel, mlp):
    # Conv1d weights stored transposed [C_in, C_out]; BN = (gamma, beta, mean, var)
    ks = iter(jax.random.split(key, 12 + 6 * len(mlp)))

    def conv(cin, cout, scale):
        return (scale * jax.random.normal(next(ks), (cin, cout), jnp.float32),
                0.05 * jax.random.normal(next(ks), (cout,), jnp.float32))

    def bn(c):
        return (1.0 + 0.1 * jax.random.normal(next(ks), (c,), jnp.float32),
                0.1 * jax.random.normal(next(ks), (c,), jnp.float32),
                0.1 * jax.random.normal(next(ks), (c,), jnp.float32),
                jax.random.uniform(next(ks), (c,), jnp.float32, 0.5, 1.5))

    p = {"l0": conv(pos_channel, mlp[0], 0.3), "f0": conv(feat_channel, mlp[0], 0.3),
         "bn_l0": bn(mlp[0]), "bn_f0": bn(mlp[0]), "convs": [], "bns": []}
    last = mlp[0]
    for c in mlp[1:]:
        p["convs"].append(conv(last, c, 0.2))
        p["bns"].append(bn(c))
        last = c
    return p


def _fold_bn(w, b, bn, eps=1e-5):
    gamma, beta, mean, var = bn
    s = gamma / jnp.sqrt(var + eps)
    return w * s[None, :], b * s + (beta - mean * s)


def _fold_params(params):
    # TODO(synk): BatchNorm1d folded in eval mode (running stats); training-mode
    # batch statistics would need a global cross-tile reduction.
    wl, bl = _fold_bn(*params["l0"], params["bn_l0"])
    wf, bf = _fold_bn(*params["f0"], params["bn_f0"])
    # channel de-differentiation fused: loc_conv(x_pos)+feat_conv(x_feat)
    # == concat(x_pos, x_feat) @ vstack(wl, wf)
    w0 = jnp.concatenate([wl, wf], axis=0)
    b0 = (bl + bf)[None, :]
    layers = [_fold_bn(*c, bn) for c, bn in zip(params["convs"], params["bns"])]
    return {"w0": w0, "b0": b0, "layers": [(w, b[None, :]) for w, b in layers]}


# ---------------------------------------------------------------------------
# Pallas kernel: fused conv0 + ReLU -> chained convs + ReLU -> max over ns
# ---------------------------------------------------------------------------
def _make_mlp_kernel(num_extra):
    def kernel(*refs):
        x_ref, w0_ref, b0_ref = refs[:3]
        layer_refs = refs[3:3 + 2 * num_extra]
        out_ref = refs[3 + 2 * num_extra]

        ns, tm, c0 = x_ref.shape

        # whole (TM points x ns neighbours) tile as one matmul operand
        x = x_ref[...].reshape(ns * tm, c0)
        h = jnp.dot(x, w0_ref[...], preferred_element_type=jnp.float32)
        h = jnp.maximum(h + b0_ref[...], 0.0)           # BN folded -> bias + ReLU

        for li in range(num_extra):
            w = layer_refs[2 * li][...]
            b = layer_refs[2 * li + 1][...]
            h = jnp.maximum(
                jnp.dot(h.astype(w.dtype), w, preferred_element_type=jnp.float32)
                + b, 0.0)

        c_out = h.shape[-1]
        # max over the nsample (leading) axis: element-wise VPU reduction
        out_ref[...] = jnp.max(h.reshape(ns, tm, c_out), axis=0)
    return kernel


def _mlp_max_pallas(x_g, folded, *, tm_max=512, mxu_dtype=jnp.float32):
    m, ns, c0 = x_g.shape
    w0, b0 = folded["w0"], folded["b0"]
    layers = list(folded["layers"])
    c_last = layers[-1][0].shape[1] if layers else w0.shape[1]

    # Lane-dense output stores: zero-pad the final output channels to 128*k.
    c_pad = _round_up(c_last, 128)
    if c_pad != c_last:
        if layers:
            w, b = layers[-1]
            layers[-1] = (jnp.pad(w, ((0, 0), (0, c_pad - c_last))),
                          jnp.pad(b, ((0, 0), (0, c_pad - c_last))))
        else:
            w0 = jnp.pad(w0, ((0, 0), (0, c_pad - c_last)))
            b0 = jnp.pad(b0, ((0, 0), (0, c_pad - c_last)))

    # large row tile (sweepable), padded point count
    tm = min(tm_max, _round_up(m, 8))
    m_pad = _round_up(m, tm)

    # neighbour-major layout: [M, ns, C] -> [ns, M_pad, C]
    x = jnp.pad(x_g.astype(jnp.float32), ((0, m_pad - m), (0, 0), (0, 0)))
    x = jnp.transpose(x, (1, 0, 2)).astype(mxu_dtype)

    args = [x, w0.astype(mxu_dtype), b0.astype(jnp.float32)]
    in_specs = [
        pl.BlockSpec((ns, tm, c0), lambda i: (0, i, 0)),
        pl.BlockSpec(w0.shape, lambda i: (0, 0)),
        pl.BlockSpec(b0.shape, lambda i: (0, 0)),
    ]
    for w, b in layers:
        args += [w.astype(mxu_dtype), b.astype(jnp.float32)]
        in_specs += [pl.BlockSpec(w.shape, lambda i: (0, 0)),
                     pl.BlockSpec(b.shape, lambda i: (0, 0))]

    # explicit VMEM budget: double-buffered input/output tiles + intermediates
    widest = max([w0.shape[1]] + [w.shape[1] for w, _ in layers])
    in_itemsize = jnp.dtype(mxu_dtype).itemsize
    need = (2 * ns * tm * c0 * in_itemsize
            + 2 * tm * c_pad * 4
            + 3 * ns * tm * widest * 4)
    vmem_limit = int(min(max(need + (8 << 20), 16 << 20), 64 << 20))

    out = pl.pallas_call(
        _make_mlp_kernel(len(layers)),
        out_shape=jax.ShapeDtypeStruct((m_pad, c_pad), jnp.float32),
        grid=(m_pad // tm,),
        in_specs=in_specs,
        out_specs=pl.BlockSpec((tm, c_pad), lambda i: (i, 0)),
        compiler_params=pltpu.CompilerParams(
            dimension_semantics=("parallel",),
            vmem_limit_bytes=vmem_limit),
    )(*args)
    return out[:m, :c_last]


# ---------------------------------------------------------------------------
# Full forward (SurfaceAbstractionCD.forward)
# ---------------------------------------------------------------------------
def surface_abstraction_cd(center, normal, feature, offset, params, *,
                           stride, nsample, return_polar=True,
                           tm_max=512, mxu_dtype=jnp.float32):
    offset_np = np.asarray(offset)
    new_center, new_normal, new_offset_np, grouped = _sample_and_group(
        stride, nsample, center, normal, feature, offset_np, return_polar)
    folded = _fold_params(params)
    new_feature = _mlp_max_pallas(grouped, folded,
                                  tm_max=tm_max, mxu_dtype=mxu_dtype)
    return new_center, new_normal, new_feature, jnp.asarray(new_offset_np)


# ---------------------------------------------------------------------------
# Pure-JAX reference of the in-kernel math (un-folded BN; sanity check)
# ---------------------------------------------------------------------------
def _reference_mlp(x_g, params, pos_channel, eps=1e-5):
    def bn_apply(h, bn):
        gamma, beta, mean, var = bn
        return (h - mean) * gamma / jnp.sqrt(var + eps) + beta

    wl, bl = params["l0"]
    wf, bf = params["f0"]
    loc = bn_apply(x_g[..., :pos_channel] @ wl + bl, params["bn_l0"])
    feat = bn_apply(x_g[..., pos_channel:] @ wf + bf, params["bn_f0"])
    h = jnp.maximum(loc + feat, 0.0)
    for (w, b), bn in zip(params["convs"], params["bns"]):
        h = jnp.maximum(bn_apply(h @ w + b, bn), 0.0)
    return jnp.max(h, axis=1)


if __name__ == "__main__":
    key = jax.random.PRNGKey(0)
    k_c, k_n, k_f, k_p = jax.random.split(key, 4)

    # small shapes consistent with the module (2 point clouds stacked)
    n_per, n_seg = 64, 2
    n_total = n_per * n_seg
    stride, nsample = 2, 8
    return_polar = True
    normal_dim, extra_feat_dim = 10, 3           # repsurf feature + e.g. color
    pos_channel = 6 if return_polar else 3
    feat_channel = normal_dim + extra_feat_dim
    mlp = [16, 32]

    center = jax.random.normal(k_c, (n_total, 3), jnp.float32)
    normal = jax.random.normal(k_n, (n_total, normal_dim), jnp.float32)
    feature = jax.random.normal(k_f, (n_total, extra_feat_dim), jnp.float32)
    offset = jnp.array([n_per, n_total], dtype=jnp.int32)

    params = init_params(k_p, pos_channel, feat_channel, mlp)

    new_center, new_normal, new_feature, new_offset = surface_abstraction_cd(
        center, normal, feature, offset, params,
        stride=stride, nsample=nsample, return_polar=return_polar)
    new_feature = jax.block_until_ready(new_feature)

    m = int(np.asarray(new_offset)[-1])
    assert new_center.shape == (m, 3)
    assert new_normal.shape == (m, normal_dim)
    assert new_feature.shape == (m, mlp[-1])
    assert bool(jnp.all(jnp.isfinite(new_feature)))

    # reference check: same grouped features through an un-folded plain-JAX MLP
    _, _, _, grouped = _sample_and_group(
        stride, nsample, center, normal, feature, np.asarray(offset), return_polar)
    ref = _reference_mlp(grouped, params, pos_channel)
    assert bool(jnp.allclose(new_feature, ref, rtol=1e-3, atol=1e-3))

    print("KERNEL_OK")
</pallas_src>

<mosaic_0001>
module attributes {stable_mosaic.version = 11 : i64} {
  func.func @kernel(%arg0: i32, %arg1: memref<8x64x19xf32, #tpu.memory_space<vmem>>, %arg2: memref<19x16xf32, #tpu.memory_space<vmem>>, %arg3: memref<1x16xf32, #tpu.memory_space<vmem>>, %arg4: memref<16x128xf32, #tpu.memory_space<vmem>>, %arg5: memref<1x128xf32, #tpu.memory_space<vmem>>, %arg6: memref<64x128xf32, #tpu.memory_space<vmem>>) attributes {dimension_semantics = [#tpu.dimension_semantics<parallel>], iteration_bounds = array<i64: 1>, scalar_prefetch = 0 : i64, scratch_operands = 0 : i64, tpu.core_type = #tpu.core_type<tc>, window_params = [{transform_indices = @transform_0, window_bounds = array<i64: 8, 64, 19>}, {pipeline_mode = #tpu.pipeline_mode<synchronous>, transform_indices = @transform_1, window_bounds = array<i64: 19, 16>}, {pipeline_mode = #tpu.pipeline_mode<synchronous>, transform_indices = @transform_2, window_bounds = array<i64: 1, 16>}, {pipeline_mode = #tpu.pipeline_mode<synchronous>, transform_indices = @transform_3, window_bounds = array<i64: 16, 128>}, {pipeline_mode = #tpu.pipeline_mode<synchronous>, transform_indices = @transform_4, window_bounds = array<i64: 1, 128>}, {transform_indices = @transform_5, window_bounds = array<i64: 64, 128>}]} {
    %c0 = arith.constant 0 : index
    %c0_0 = arith.constant 0 : index
    %c0_1 = arith.constant 0 : index
    %0 = vector.load %arg1[%c0, %c0_0, %c0_1] : memref<8x64x19xf32, #tpu.memory_space<vmem>>, vector<8x64x19xf32>
    %1 = vector.shape_cast %0 : vector<8x64x19xf32> to vector<512x19xf32>
    %c0_2 = arith.constant 0 : index
    %c0_3 = arith.constant 0 : index
    %2 = vector.load %arg2[%c0_2, %c0_3] : memref<19x16xf32, #tpu.memory_space<vmem>>, vector<19x16xf32>
    %cst = arith.constant dense<0.000000e+00> : vector<512x16xf32>
    %3 = tpu.matmul %1, %2, %cst {dimension_numbers = #tpu.dot_dimension_numbers<[1], [0], [0], [1], [0, 0, 1, 1], [], []>} : vector<512x19xf32>, vector<19x16xf32>, vector<512x16xf32> -> vector<512x16xf32>
    %c0_4 = arith.constant 0 : index
    %c0_5 = arith.constant 0 : index
    %4 = vector.load %arg3[%c0_4, %c0_5] : memref<1x16xf32, #tpu.memory_space<vmem>>, vector<1x16xf32>
    %5 = vector.broadcast %4 : vector<1x16xf32> to vector<512x16xf32>
    %6 = arith.addf %3, %5 : vector<512x16xf32>
    %cst_6 = arith.constant 0.000000e+00 : f32
    %7 = vector.broadcast %cst_6 : f32 to vector<512x16xf32>
    %8 = arith.maximumf %6, %7 : vector<512x16xf32>
    %c0_7 = arith.constant 0 : index
    %c0_8 = arith.constant 0 : index
    %9 = vector.load %arg4[%c0_7, %c0_8] : memref<16x128xf32, #tpu.memory_space<vmem>>, vector<16x128xf32>
    %c0_9 = arith.constant 0 : index
    %c0_10 = arith.constant 0 : index
    %10 = vector.load %arg5[%c0_9, %c0_10] : memref<1x128xf32, #tpu.memory_space<vmem>>, vector<1x128xf32>
    %cst_11 = arith.constant dense<0.000000e+00> : vector<512x128xf32>
    %11 = tpu.matmul %8, %9, %cst_11 {dimension_numbers = #tpu.dot_dimension_numbers<[1], [0], [0], [1], [0, 0, 1, 1], [], []>} : vector<512x16xf32>, vector<16x128xf32>, vector<512x128xf32> -> vector<512x128xf32>
    %12 = vector.broadcast %10 : vector<1x128xf32> to vector<512x128xf32>
    %13 = arith.addf %11, %12 : vector<512x128xf32>
    %cst_12 = arith.constant 0.000000e+00 : f32
    %14 = vector.broadcast %cst_12 : f32 to vector<512x128xf32>
    %15 = arith.maximumf %13, %14 : vector<512x128xf32>
    %16 = vector.shape_cast %15 : vector<512x128xf32> to vector<8x64x128xf32>
    %cst_13 = arith.constant dense<0xFF800000> : vector<64x128xf32>
    %17 = vector.multi_reduction <maximumf>, %16, %cst_13 [0] : vector<8x64x128xf32> to vector<64x128xf32>
    %c0_14 = arith.constant 0 : index
    %c0_15 = arith.constant 0 : index
    %18 = vector.load %arg6[%c0_14, %c0_15] : memref<64x128xf32, #tpu.memory_space<vmem>>, vector<64x128xf32>
    tpu.vector_store %arg6[%c0_14, %c0_15], %17 {strides = array<i32>} : memref<64x128xf32, #tpu.memory_space<vmem>>, vector<64x128xf32>,
    return
  }
  func.func @transform_0(%arg0: i32) -> (i32, i32, i32) {
    %c0_i32 = arith.constant 0 : i32
    %c0_i32_0 = arith.constant 0 : i32
    %c0_i32_1 = arith.constant 0 : i32
    return %c0_i32, %arg0, %c0_i32_0 : i32, i32, i32
  }
  func.func @transform_1(%arg0: i32) -> (i32, i32) {
    %c0_i32 = arith.constant 0 : i32
    %c0_i32_0 = arith.constant 0 : i32
    %c0_i32_1 = arith.constant 0 : i32
    return %c0_i32, %c0_i32_0 : i32, i32
  }
  func.func @transform_2(%arg0: i32) -> (i32, i32) {
    %c0_i32 = arith.constant 0 : i32
    %c0_i32_0 = arith.constant 0 : i32
    %c0_i32_1 = arith.constant 0 : i32
    return %c0_i32, %c0_i32_0 : i32, i32
  }
  func.func @transform_3(%arg0: i32) -> (i32, i32) {
    %c0_i32 = arith.constant 0 : i32
    %c0_i32_0 = arith.constant 0 : i32
    %c0_i32_1 = arith.constant 0 : i32
    return %c0_i32, %c0_i32_0 : i32, i32
  }
  func.func @transform_4(%arg0: i32) -> (i32, i32) {
    %c0_i32 = arith.constant 0 : i32
    %c0_i32_0 = arith.constant 0 : i32
    %c0_i32_1 = arith.constant 0 : i32
    return %c0_i32, %c0_i32_0 : i32, i32
  }
  func.func @transform_5(%arg0: i32) -> (i32, i32) {
    %c0_i32 = arith.constant 0 : i32
    %c0_i32_0 = arith.constant 0 : i32
    return %arg0, %c0_i32 : i32, i32
  }
}

</mosaic_0001>

<bundles_post_ra>
// kernel: tpu_custom_call.1
= control target key start
LH: loop header
LB: loop body
LE: loop exit
PB: predicated region body
PF: predicated region fallthrough
CT: control target
= control target key end

     0   :  { %vm95_vm0 = vcmask 154624   ;;  %vm288_vm1 = vcmask 1042432   ;;  %s2491_s0 = inlined_call_operand.vmem [shape: f32[8,64,19], index: 0, kind: input, shape index: {}]   ;;  %s2492_s1 = inlined_call_operand.vmem [shape: f32[19,16], index: 1, kind: input, shape index: {}]   ;;  %s2493_s2 = inlined_call_operand.vmem [shape: f32[1,16], index: 2, kind: input, shape index: {}]   ;;  %s2494_s3 = inlined_call_operand.vmem [shape: f32[16,128], index: 3, kind: input, shape index: {}]   ;;  %s2495_s4 = inlined_call_operand.vmem [shape: f32[1,128], index: 4, kind: input, shape index: {}]   ;;  %s2496_s5 = inlined_call_operand.hbm [shape: f32[64,128], index: 5, kind: output, shape index: {}]  }
   0x1   :  { %v85_v0 = vld [vmem:[%s2492_s1] sm:$0xff]  ;;  %v86_v1 = vld [vmem:[%s2492_s1 + $0x8] sm:$0xff]  ;;  %v87_v4 = vld [vmem:[%s2492_s1 + $0x10] sm:$0x7] }
   0x2   :  { %v1938_v2 = vpack.c.bf16 %v86_v1, %v85_v0  ;;  %v21_v3 = vld [vmem:[%s2491_s0] sm:$0xff]  ;;  %v22_v5 = vld [vmem:[%s2491_s0 + $0x8] sm:$0xff]  ;;  %v23_v6 = vld [vmem:[%s2491_s0 + $0x10] sm:$0xff] }
   0x3   :  { %1742 = vmatprep.mubr.msk.f32.mxu0 %vm95_vm0, %v21_v3  ;;  %v24_v7 = vld [vmem:[%s2491_s0 + $0x18] sm:$0xff]  ;;  %v25_v8 = vld [vmem:[%s2491_s0 + $0x20] sm:$0xff]  ;;  %v26_v9 = vld [vmem:[%s2491_s0 + $0x28] sm:$0xff] }
   0x4   :  { %1939 = vmatprep.subr.bf16.mxu0 %v1938_v2  ;;  %v27_v10 = vld [vmem:[%s2491_s0 + $0x30] sm:$0xff]  ;;  %v28_v11 = vld [vmem:[%s2491_s0 + $0x38] sm:$0xff]  ;;  %v29_v12 = vld [vmem:[%s2491_s0 + $0x40] sm:$0xff] }
   0x5   :  { %1941 = vmatpush3.bf16.msra.mxu0 %v1938_v2  ;;  %v30_v13 = vld [vmem:[%s2491_s0 + $0x48] sm:$0xff] }
   0x6   :  { %1740 = vmatprep.subr.msk.mxu0 %vm288_vm1, %v87_v4 }
   0x9   :  { %1741 = vmatpush3.msk.msra.mxu0 %vm288_vm1, %v87_v4 }
   0xa   :  { %1743 = vmatmul.mubr.msk.f32.vlgmr.msra.gmra.mrb[0].mxu0 %vm95_vm0, %v22_v5 }
   0xb   :  { %1745 = vmatprep.mubr.msk.f32.mxu0 %vm95_vm0, %v23_v6 }
   0xe   :  { %1746 = vmatmul.mubr.msk.f32.gmra.mrb[2].mxu0 %vm95_vm0, %v24_v7 }
   0xf   :  { %1748 = vmatprep.mubr.msk.f32.mxu0 %vm95_vm0, %v25_v8 }
  0x12   :  { %1749 = vmatmul.mubr.msk.f32.gmra.mrb[4].mxu0 %vm95_vm0, %v26_v9 }
  0x13   :  { %1751 = vmatprep.mubr.msk.f32.mxu0 %vm95_vm0, %v27_v10 }
  0x16   :  { %1752 = vmatmul.mubr.msk.f32.gmra.mrb[6].mxu0 %vm95_vm0, %v28_v11 }
  0x17   :  { %1754 = vmatprep.mubr.msk.f32.mxu0 %vm95_vm0, %v29_v12 }
  0x18   :  { %10 = vsyncpa [#allocation3], 0  ;;  %v31_v14 = vld [vmem:[%s2491_s0 + $0x50] sm:$0xff]  ;;  %v32_v15 = vld [vmem:[%s2491_s0 + $0x58] sm:$0xff]  ;;  %vm750_vm2 = vcmask 130048  }
  0x19   :  { %v33_v16 = vld [vmem:[%s2491_s0 + $0x60] sm:$0xff]  ;;  %v34_v17 = vld [vmem:[%s2491_s0 + $0x68] sm:$0xff]  ;;  %v35_v18 = vld [vmem:[%s2491_s0 + $0x70] sm:$0xff] }
  0x1a   :  { %1755 = vmatmul.mubr.msk.f32.gmra.mrb[8].mxu0 %vm95_vm0, %v30_v13  ;;  %v36_v19 = vld [vmem:[%s2491_s0 + $0x78] sm:$0xff]  ;;  %v37_v20 = vld [vmem:[%s2491_s0 + $0x80] sm:$0xff]  ;;  %v38_v21 = vld [vmem:[%s2491_s0 + $0x88] sm:$0xff] }
  0x1b   :  { %1757 = vmatprep.mubr.msk.f32.mxu0 %vm95_vm0, %v31_v14  ;;  %v39_v22 = vld [vmem:[%s2491_s0 + $0x90] sm:$0xff]  ;;  %v40_v23 = vld [vmem:[%s2491_s0 + $0x98] sm:$0xff]  ;;  %v41_v24 = vld [vmem:[%s2491_s0 + $0xa0] sm:$0xff] }
  0x1c   :  { %v42_v25 = vld [vmem:[%s2491_s0 + $0xa8] sm:$0xff]  ;;  %v43_v26 = vld [vmem:[%s2491_s0 + $0xb0] sm:$0xff]  ;;  %v44_v27 = vld [vmem:[%s2491_s0 + $0xb8] sm:$0xff] }
  0x1d   :  { %v45_v28 = vld [vmem:[%s2491_s0 + $0xc0] sm:$0xff]  ;;  %v46_v29 = vld [vmem:[%s2491_s0 + $0xc8] sm:$0xff]  ;;  %v47_v30 = vld [vmem:[%s2491_s0 + $0xd0] sm:$0xff] }
  0x1e   :  { %1758 = vmatmul.mubr.msk.f32.gmra.mrb[10].mxu0 %vm95_vm0, %v32_v15  ;;  %v48_v31 = vld [vmem:[%s2491_s0 + $0xd8] sm:$0xff]  ;;  %v49_v32 = vld [vmem:[%s2491_s0 + $0xe0] sm:$0xff]  ;;  %v50_v33 = vld [vmem:[%s2491_s0 + $0xe8] sm:$0xff] }
  0x1f   :  { %1760 = vmatprep.mubr.msk.f32.mxu0 %vm95_vm0, %v33_v16  ;;  %v51_v34 = vld [vmem:[%s2491_s0 + $0xf0] sm:$0xff]  ;;  %v52_v35 = vld [vmem:[%s2491_s0 + $0xf8] sm:$0xff]  ;;  %v53_v36 = vld [vmem:[%s2491_s0 + $0x100] sm:$0xff] }
  0x20   :  { %v54_v37 = vld [vmem:[%s2491_s0 + $0x108] sm:$0xff]  ;;  %v55_v38 = vld [vmem:[%s2491_s0 + $0x110] sm:$0xff]  ;;  %v56_v39 = vld [vmem:[%s2491_s0 + $0x118] sm:$0xff] }
  0x21   :  { %v57_v40 = vld [vmem:[%s2491_s0 + $0x120] sm:$0xff]  ;;  %v58_v41 = vld [vmem:[%s2491_s0 + $0x128] sm:$0xff]  ;;  %v59_v42 = vld [vmem:[%s2491_s0 + $0x130] sm:$0xff] }
  0x22   :  { %1761 = vmatmul.mubr.msk.f32.gmra.mrb[12].mxu0 %vm95_vm0, %v34_v17  ;;  %v60_v43 = vld [vmem:[%s2491_s0 + $0x138] sm:$0xff]  ;;  %v61_v44 = vld [vmem:[%s2491_s0 + $0x140] sm:$0xff]  ;;  %v62_v45 = vld [vmem:[%s2491_s0 + $0x148] sm:$0xff] }
  0x23   :  { %1763 = vmatprep.mubr.msk.f32.mxu0 %vm95_vm0, %v35_v18  ;;  %v63_v46 = vld [vmem:[%s2491_s0 + $0x150] sm:$0xff]  ;;  %v64_v47 = vld [vmem:[%s2491_s0 + $0x158] sm:$0xff]  ;;  %v65_v48 = vld [vmem:[%s2491_s0 + $0x160] sm:$0xff] }
  0x24   :  { %v741_v49 = vld [vmem:[%s2494_s3] sm:$0xff]  ;;  %v742_v50 = vld [vmem:[%s2494_s3 + $0x8] sm:$0xff]  ;;  %v67_v53 = vld [vmem:[%s2491_s0 + $0x170] sm:$0xff] }
  0x25   :  { %v1942_v51 = vpack.c.bf16 %v742_v50, %v741_v49  ;;  %v66_v52 = vld [vmem:[%s2491_s0 + $0x168] sm:$0xff]  ;;  %v68_v54 = vld [vmem:[%s2491_s0 + $0x178] sm:$0xff]  ;;  %v69_v55 = vld [vmem:[%s2491_s0 + $0x180] sm:$0xff] }
  0x26   :  { %1764 = vmatmul.mubr.msk.f32.gmra.mrb[14].mxu0 %vm95_vm0, %v36_v19  ;;  %v70_v56 = vld [vmem:[%s2491_s0 + $0x188] sm:$0xff]  ;;  %v71_v57 = vld [vmem:[%s2491_s0 + $0x190] sm:$0xff]  ;;  %v72_v58 = vld [vmem:[%s2491_s0 + $0x198] sm:$0xff] }
  0x27   :  { %1766 = vmatprep.mubr.msk.f32.mxu0 %vm95_vm0, %v37_v20  ;;  %1943 = vmatprep.subr.bf16.mxu1 %v1942_v51  ;;  %v73_v59 = vld [vmem:[%s2491_s0 + $0x1a0] sm:$0xff]  ;;  %v74_v60 = vld [vmem:[%s2491_s0 + $0x1a8] sm:$0xff]  ;;  %v75_v61 = vld [vmem:[%s2491_s0 + $0x1b0] sm:$0xff] }
  0x28   :  { %1945 = vmatpush3.bf16.msra.mxu1 %v1942_v51  ;;  %v76_v62 = vld [vmem:[%s2491_s0 + $0x1b8] sm:$0xff]  ;;  %v77_v63 = vld [vmem:[%s2491_s0 + $0x1c0] sm:$0xff]  ;;  %v78_v0 = vld [vmem:[%s2491_s0 + $0x1c8] sm:$0xff] }
  0x29   :  { %v79_v1 = vld [vmem:[%s2491_s0 + $0x1d0] sm:$0xff]  ;;  %v80_v2 = vld [vmem:[%s2491_s0 + $0x1d8] sm:$0xff]  ;;  %v81_v3 = vld [vmem:[%s2491_s0 + $0x1e0] sm:$0xff] }
  0x2a   :  { %1767 = vmatmul.mubr.msk.f32.gmra.mrb[16].mxu0 %vm95_vm0, %v38_v21  ;;  %v82_v4 = vld [vmem:[%s2491_s0 + $0x1e8] sm:$0xff]  ;;  %v83_v5 = vld [vmem:[%s2491_s0 + $0x1f0] sm:$0xff]  ;;  %v84_v6 = vld [vmem:[%s2491_s0 + $0x1f8] sm:$0xff] }
  0x2b   :  { %1769 = vmatprep.mubr.msk.f32.mxu0 %vm95_vm0, %v39_v22  ;;  %v2280_v7 = vld [vmem:[%s2493_s2] ss:$0 sm:$0xff] }
  0x2e   :  { %1770 = vmatmul.mubr.msk.f32.gmra.mrb[18].mxu0 %vm95_vm0, %v40_v23 }
  0x2f   :  { %1772 = vmatprep.mubr.msk.f32.mxu0 %vm95_vm0, %v41_v24 }
  0x32   :  { %1773 = vmatmul.mubr.msk.f32.gmra.mrb[20].mxu0 %vm95_vm0, %v42_v25 }
  0x33   :  { %1775 = vmatprep.mubr.msk.f32.mxu0 %vm95_vm0, %v43_v26 }
  0x36   :  { %1776 = vmatmul.mubr.msk.f32.gmra.mrb[22].mxu0 %vm95_vm0, %v44_v27 }
  0x37   :  { %1778 = vmatprep.mubr.msk.f32.mxu0 %vm95_vm0, %v45_v28 }
  0x3a   :  { %1779 = vmatmul.mubr.msk.f32.gmra.mrb[24].mxu0 %vm95_vm0, %v46_v29 }
  0x3b   :  { %1781 = vmatprep.mubr.msk.f32.mxu0 %vm95_vm0, %v47_v30 }
  0x3e   :  { %1782 = vmatmul.mubr.msk.f32.gmra.mrb[26].mxu0 %vm95_vm0, %v48_v31 }
  0x3f   :  { %1784 = vmatprep.mubr.msk.f32.mxu0 %vm95_vm0, %v49_v32 }
  0x42   :  { %1785 = vmatmul.mubr.msk.f32.gmra.mrb[28].mxu0 %vm95_vm0, %v50_v33 }
  0x43   :  { %1787 = vmatprep.mubr.msk.f32.mxu0 %vm95_vm0, %v51_v34 }
  0x46   :  { %1788 = vmatmul.mubr.msk.f32.gmra.mrb[30].mxu0 %vm95_vm0, %v52_v35 }
  0x47   :  { %1790 = vmatprep.mubr.msk.f32.mxu0 %vm95_vm0, %v53_v36 }
  0x4a   :  { %1791 = vmatmul.mubr.msk.f32.gmra.mrb[32].mxu0 %vm95_vm0, %v54_v37 }
  0x4b   :  { %1793 = vmatprep.mubr.msk.f32.mxu0 %vm95_vm0, %v55_v38 }
  0x4e   :  { %1794 = vmatmul.mubr.msk.f32.gmra.mrb[34].mxu0 %vm95_vm0, %v56_v39 }
  0x4f   :  { %1796 = vmatprep.mubr.msk.f32.mxu0 %vm95_vm0, %v57_v40 }
  0x52   :  { %1797 = vmatmul.mubr.msk.f32.gmra.mrb[36].mxu0 %vm95_vm0, %v58_v41 }
  0x53   :  { %1799 = vmatprep.mubr.msk.f32.mxu0 %vm95_vm0, %v59_v42 }
  0x56   :  { %1800 = vmatmul.mubr.msk.f32.gmra.mrb[38].mxu0 %vm95_vm0, %v60_v43 }
  0x57   :  { %1802 = vmatprep.mubr.msk.f32.mxu0 %vm95_vm0, %v61_v44 }
  0x5a   :  { %1803 = vmatmul.mubr.msk.f32.gmra.mrb[40].mxu0 %vm95_vm0, %v62_v45 }
  0x5b   :  { %1805 = vmatprep.mubr.msk.f32.mxu0 %vm95_vm0, %v63_v46 }
  0x5e   :  { %1806 = vmatmul.mubr.msk.f32.gmra.mrb[42].mxu0 %vm95_vm0, %v64_v47 }
  0x5f   :  { %1808 = vmatprep.mubr.msk.f32.mxu0 %vm95_vm0, %v65_v48 }
  0x62   :  { %1809 = vmatmul.mubr.msk.f32.gmra.mrb[44].mxu0 %vm95_vm0, %v66_v52 }
  0x63   :  { %1811 = vmatprep.mubr.msk.f32.mxu0 %vm95_vm0, %v67_v53 }
  0x66   :  { %1812 = vmatmul.mubr.msk.f32.gmra.mrb[46].mxu0 %vm95_vm0, %v68_v54 }
  0x67   :  { %1814 = vmatprep.mubr.msk.f32.mxu0 %vm95_vm0, %v69_v55 }
  0x6a   :  { %1815 = vmatmul.mubr.msk.f32.gmra.mrb[48].mxu0 %vm95_vm0, %v70_v56 }
  0x6b   :  { %1817 = vmatprep.mubr.msk.f32.mxu0 %vm95_vm0, %v71_v57 }
  0x6e   :  { %1818 = vmatmul.mubr.msk.f32.gmra.mrb[50].mxu0 %vm95_vm0, %v72_v58 }
  0x6f   :  { %1820 = vmatprep.mubr.msk.f32.mxu0 %vm95_vm0, %v73_v59 }
  0x72   :  { %1821 = vmatmul.mubr.msk.f32.gmra.mrb[52].mxu0 %vm95_vm0, %v74_v60 }
  0x73   :  { %1823 = vmatprep.mubr.msk.f32.mxu0 %vm95_vm0, %v75_v61 }
  0x76   :  { %1824 = vmatmul.mubr.msk.f32.gmra.mrb[54].mxu0 %vm95_vm0, %v76_v62 }
  0x77   :  { %1826 = vmatprep.mubr.msk.f32.mxu0 %vm95_vm0, %v77_v63 }
  0x7a   :  { %1827 = vmatmul.mubr.msk.f32.gmra.mrb[56].mxu0 %vm95_vm0, %v78_v0 }
  0x7b   :  { %1829 = vmatprep.mubr.msk.f32.mxu0 %vm95_vm0, %v79_v1 }
  0x7e   :  { %1830 = vmatmul.mubr.msk.f32.gmra.mrb[58].mxu0 %vm95_vm0, %v80_v2 }
  0x7f   :  { %1832 = vmatprep.mubr.msk.f32.mxu0 %vm95_vm0, %v81_v3 }
  0x82   :  { %1833 = vmatmul.mubr.msk.f32.gmra.mrb[60].mxu0 %vm95_vm0, %v82_v4 }
  0x83   :  { %1835 = vmatprep.mubr.msk.f32.mxu0 %vm95_vm0, %v83_v5 }
  0x86   :  { %1836 = vmatmul.mubr.msk.f32.gmra.mrb[62].mxu0 %vm95_vm0, %v84_v6 }
  0xdd   :  { %v1744_v8 = vpop.f32.mrb[0].mxu0 }
  0xde   :  { %v364_v9 = vadd.f32 %v1744_v8, %v2280_v7  ;;  %v358_v10 = vpop.f32.mrb[1].mxu0 }
  0xdf   :  { %v359_v11 = vadd.f32 %v2280_v7, %v358_v10 }
  0xe0   :  { %v678_v14 = vmax.f32 %v364_v9, 0.0 }
  0xe1   :  { %v677_v12 = vmax.f32 %v359_v11, 0.0  ;;  %v1747_v13 = vpop.f32.mrb[2].mxu0 }
  0xe2   :  { %v374_v15 = vadd.f32 %v1747_v13, %v2280_v7  ;;  %v368_v16 = vpop.f32.mrb[3].mxu0 }
  0xe3   :  { %v369_v17 = vadd.f32 %v2280_v7, %v368_v16  ;;  %1842 = vmatprep.mubr.msk.f32.mxu1 %vm750_vm2, %v677_v12 }
  0xe4   :  { %1843 = vmatmul.mubr.msk.f32.vlgmr.msra.gmra.mrb[0].mxu1 %vm750_vm2, %v678_v14  ;;  %v680_v20 = vmax.f32 %v374_v15, 0.0 }
  0xe5   :  { %v679_v18 = vmax.f32 %v369_v17, 0.0  ;;  %v1750_v19 = vpop.f32.mrb[4].mxu0 }
  0xe6   :  { %v384_v21 = vadd.f32 %v1750_v19, %v2280_v7  ;;  %v378_v22 = vpop.f32.mrb[5].mxu0 }
  0xe7   :  { %v379_v23 = vadd.f32 %v2280_v7, %v378_v22  ;;  %1845 = vmatprep.mubr.msk.f32.mxu1 %vm750_vm2, %v679_v18 }
  0xe8   :  { %1846 = vmatmul.mubr.msk.f32.gmra.mrb[2].mxu1 %vm750_vm2, %v680_v20  ;;  %v682_v26 = vmax.f32 %v384_v21, 0.0 }
  0xe9   :  { %v681_v24 = vmax.f32 %v379_v23, 0.0  ;;  %v1753_v25 = vpop.f32.mrb[6].mxu0 }
  0xea   :  { %v394_v27 = vadd.f32 %v1753_v25, %v2280_v7  ;;  %v388_v28 = vpop.f32.mrb[7].mxu0 }
  0xeb   :  { %v389_v29 = vadd.f32 %v2280_v7, %v388_v28  ;;  %1848 = vmatprep.mubr.msk.f32.mxu1 %vm750_vm2, %v681_v24 }
  0xec   :  { %1849 = vmatmul.mubr.msk.f32.gmra.mrb[4].mxu1 %vm750_vm2, %v682_v26  ;;  %v684_v32 = vmax.f32 %v394_v27, 0.0 }
  0xed   :  { %v683_v30 = vmax.f32 %v389_v29, 0.0  ;;  %v1756_v31 = vpop.f32.mrb[8].mxu0 }
  0xee   :  { %v404_v33 = vadd.f32 %v1756_v31, %v2280_v7  ;;  %v398_v34 = vpop.f32.mrb[9].mxu0 }
  0xef   :  { %v399_v35 = vadd.f32 %v2280_v7, %v398_v34  ;;  %1851 = vmatprep.mubr.msk.f32.mxu1 %vm750_vm2, %v683_v30 }
  0xf0   :  { %1852 = vmatmul.mubr.msk.f32.gmra.mrb[6].mxu1 %vm750_vm2, %v684_v32  ;;  %v686_v38 = vmax.f32 %v404_v33, 0.0 }
  0xf1   :  { %v685_v36 = vmax.f32 %v399_v35, 0.0  ;;  %v1759_v37 = vpop.f32.mrb[10].mxu0 }
  0xf2   :  { %v414_v39 = vadd.f32 %v1759_v37, %v2280_v7  ;;  %v408_v40 = vpop.f32.mrb[11].mxu0 }
  0xf3   :  { %v409_v41 = vadd.f32 %v2280_v7, %v408_v40  ;;  %1854 = vmatprep.mubr.msk.f32.mxu1 %vm750_vm2, %v685_v36 }
  0xf4   :  { %1855 = vmatmul.mubr.msk.f32.gmra.mrb[8].mxu1 %vm750_vm2, %v686_v38  ;;  %v688_v44 = vmax.f32 %v414_v39, 0.0 }
  0xf5   :  { %v687_v42 = vmax.f32 %v409_v41, 0.0  ;;  %v1762_v43 = vpop.f32.mrb[12].mxu0 }
  0xf6   :  { %v424_v45 = vadd.f32 %v1762_v43, %v2280_v7  ;;  %v418_v46 = vpop.f32.mrb[13].mxu0 }
  0xf7   :  { %v419_v47 = vadd.f32 %v2280_v7, %v418_v46  ;;  %1857 = vmatprep.mubr.msk.f32.mxu1 %vm750_vm2, %v687_v42 }
  0xf8   :  { %1858 = vmatmul.mubr.msk.f32.gmra.mrb[10].mxu1 %vm750_vm2, %v688_v44  ;;  %v690_v50 = vmax.f32 %v424_v45, 0.0 }
  0xf9   :  { %v689_v48 = vmax.f32 %v419_v47, 0.0  ;;  %v1765_v49 = vpop.f32.mrb[14].mxu0 }
  0xfa   :  { %v434_v51 = vadd.f32 %v1765_v49, %v2280_v7  ;;  %v428_v52 = vpop.f32.mrb[15].mxu0 }
  0xfb   :  { %v429_v53 = vadd.f32 %v2280_v7, %v428_v52  ;;  %1860 = vmatprep.mubr.msk.f32.mxu1 %vm750_vm2, %v689_v48 }
  0xfc   :  { %1861 = vmatmul.mubr.msk.f32.gmra.mrb[12].mxu1 %vm750_vm2, %v690_v50  ;;  %v692_v56 = vmax.f32 %v434_v51, 0.0 }
  0xfd   :  { %v691_v54 = vmax.f32 %v429_v53, 0.0  ;;  %v1768_v55 = vpop.f32.mrb[16].mxu0 }
  0xfe   :  { %v444_v57 = vadd.f32 %v1768_v55, %v2280_v7  ;;  %v438_v58 = vpop.f32.mrb[17].mxu0 }
  0xff   :  { %v439_v59 = vadd.f32 %v2280_v7, %v438_v58  ;;  %1863 = vmatprep.mubr.msk.f32.mxu1 %vm750_vm2, %v691_v54 }
 0x100   :  { %1864 = vmatmul.mubr.msk.f32.gmra.mrb[14].mxu1 %vm750_vm2, %v692_v56  ;;  %v694_v62 = vmax.f32 %v444_v57, 0.0 }
 0x101   :  { %v693_v60 = vmax.f32 %v439_v59, 0.0  ;;  %v1771_v61 = vpop.f32.mrb[18].mxu0 }
 0x102   :  { %v454_v63 = vadd.f32 %v1771_v61, %v2280_v7  ;;  %v448_v0 = vpop.f32.mrb[19].mxu0 }
 0x103   :  { %v449_v1 = vadd.f32 %v2280_v7, %v448_v0  ;;  %1866 = vmatprep.mubr.msk.f32.mxu1 %vm750_vm2, %v693_v60 }
 0x104   :  { %1867 = vmatmul.mubr.msk.f32.gmra.mrb[16].mxu1 %vm750_vm2, %v694_v62  ;;  %v696_v4 = vmax.f32 %v454_v63, 0.0 }
 0x105   :  { %v695_v2 = vmax.f32 %v449_v1, 0.0  ;;  %v1774_v3 = vpop.f32.mrb[20].mxu0 }
 0x106   :  { %v464_v5 = vadd.f32 %v1774_v3, %v2280_v7  ;;  %v458_v6 = vpop.f32.mrb[21].mxu0 }
 0x107   :  { %v459_v8 = vadd.f32 %v2280_v7, %v458_v6  ;;  %1869 = vmatprep.mubr.msk.f32.mxu1 %vm750_vm2, %v695_v2 }
 0x108   :  { %1870 = vmatmul.mubr.msk.f32.gmra.mrb[18].mxu1 %vm750_vm2, %v696_v4  ;;  %v698_v11 = vmax.f32 %v464_v5, 0.0 }
 0x109   :  { %v697_v9 = vmax.f32 %v459_v8, 0.0  ;;  %v1777_v10 = vpop.f32.mrb[22].mxu0 }
 0x10a   :  { %v474_v12 = vadd.f32 %v1777_v10, %v2280_v7  ;;  %v468_v13 = vpop.f32.mrb[23].mxu0 }
 0x10b   :  { %v469_v14 = vadd.f32 %v2280_v7, %v468_v13  ;;  %1872 = vmatprep.mubr.msk.f32.mxu1 %vm750_vm2, %v697_v9 }
 0x10c   :  { %1873 = vmatmul.mubr.msk.f32.gmra.mrb[20].mxu1 %vm750_vm2, %v698_v11  ;;  %v700_v17 = vmax.f32 %v474_v12, 0.0 }
 0x10d   :  { %v699_v15 = vmax.f32 %v469_v14, 0.0  ;;  %v1780_v16 = vpop.f32.mrb[24].mxu0 }
 0x10e   :  { %v484_v18 = vadd.f32 %v1780_v16, %v2280_v7  ;;  %v478_v19 = vpop.f32.mrb[25].mxu0 }
 0x10f   :  { %v479_v20 = vadd.f32 %v2280_v7, %v478_v19  ;;  %1875 = vmatprep.mubr.msk.f32.mxu1 %vm750_vm2, %v699_v15 }
 0x110   :  { %1876 = vmatmul.mubr.msk.f32.gmra.mrb[22].mxu1 %vm750_vm2, %v700_v17  ;;  %v702_v23 = vmax.f32 %v484_v18, 0.0 }
 0x111   :  { %v701_v21 = vmax.f32 %v479_v20, 0.0  ;;  %v1783_v22 = vpop.f32.mrb[26].mxu0 }
 0x112   :  { %v494_v24 = vadd.f32 %v1783_v22, %v2280_v7  ;;  %v488_v25 = vpop.f32.mrb[27].mxu0 }
 0x113   :  { %v489_v26 = vadd.f32 %v2280_v7, %v488_v25  ;;  %1878 = vmatprep.mubr.msk.f32.mxu1 %vm750_vm2, %v701_v21 }
 0x114   :  { %1879 = vmatmul.mubr.msk.f32.gmra.mrb[24].mxu1 %vm750_vm2, %v702_v23  ;;  %v704_v29 = vmax.f32 %v494_v24, 0.0 }
 0x115   :  { %v703_v27 = vmax.f32 %v489_v26, 0.0  ;;  %v1786_v28 = vpop.f32.mrb[28].mxu0 }
 0x116   :  { %v504_v30 = vadd.f32 %v1786_v28, %v2280_v7  ;;  %v498_v31 = vpop.f32.mrb[29].mxu0 }
 0x117   :  { %v499_v32 = vadd.f32 %v2280_v7, %v498_v31  ;;  %1881 = vmatprep.mubr.msk.f32.mxu1 %vm750_vm2, %v703_v27 }
 0x118   :  { %1882 = vmatmul.mubr.msk.f32.gmra.mrb[26].mxu1 %vm750_vm2, %v704_v29  ;;  %v706_v35 = vmax.f32 %v504_v30, 0.0 }
 0x119   :  { %v705_v33 = vmax.f32 %v499_v32, 0.0  ;;  %v1789_v34 = vpop.f32.mrb[30].mxu0 }
 0x11a   :  { %v514_v36 = vadd.f32 %v1789_v34, %v2280_v7  ;;  %v508_v37 = vpop.f32.mrb[31].mxu0 }
 0x11b   :  { %v509_v38 = vadd.f32 %v2280_v7, %v508_v37  ;;  %1884 = vmatprep.mubr.msk.f32.mxu1 %vm750_vm2, %v705_v33 }
 0x11c   :  { %1885 = vmatmul.mubr.msk.f32.gmra.mrb[28].mxu1 %vm750_vm2, %v706_v35  ;;  %v708_v41 = vmax.f32 %v514_v36, 0.0 }
 0x11d   :  { %v707_v39 = vmax.f32 %v509_v38, 0.0  ;;  %v1792_v40 = vpop.f32.mrb[32].mxu0 }
 0x11e   :  { %v524_v42 = vadd.f32 %v1792_v40, %v2280_v7  ;;  %v518_v43 = vpop.f32.mrb[33].mxu0 }
 0x11f   :  { %v519_v44 = vadd.f32 %v2280_v7, %v518_v43  ;;  %1887 = vmatprep.mubr.msk.f32.mxu1 %vm750_vm2, %v707_v39 }
 0x120   :  { %1888 = vmatmul.mubr.msk.f32.gmra.mrb[30].mxu1 %vm750_vm2, %v708_v41  ;;  %v710_v47 = vmax.f32 %v524_v42, 0.0 }
 0x121   :  { %v709_v45 = vmax.f32 %v519_v44, 0.0  ;;  %v1795_v46 = vpop.f32.mrb[34].mxu0 }
 0x122   :  { %v534_v48 = vadd.f32 %v1795_v46, %v2280_v7  ;;  %v528_v49 = vpop.f32.mrb[35].mxu0 }
 0x123   :  { %v529_v50 = vadd.f32 %v2280_v7, %v528_v49  ;;  %1890 = vmatprep.mubr.msk.f32.mxu1 %vm750_vm2, %v709_v45 }
 0x124   :  { %1891 = vmatmul.mubr.msk.f32.gmra.mrb[32].mxu1 %vm750_vm2, %v710_v47  ;;  %v712_v53 = vmax.f32 %v534_v48, 0.0 }
 0x125   :  { %v711_v51 = vmax.f32 %v529_v50, 0.0  ;;  %v1798_v52 = vpop.f32.mrb[36].mxu0 }
 0x126   :  { %v544_v54 = vadd.f32 %v1798_v52, %v2280_v7  ;;  %v538_v55 = vpop.f32.mrb[37].mxu0 }
 0x127   :  { %v539_v56 = vadd.f32 %v2280_v7, %v538_v55  ;;  %1893 = vmatprep.mubr.msk.f32.mxu1 %vm750_vm2, %v711_v51 }
 0x128   :  { %1894 = vmatmul.mubr.msk.f32.gmra.mrb[34].mxu1 %vm750_vm2, %v712_v53  ;;  %v714_v59 = vmax.f32 %v544_v54, 0.0 }
 0x129   :  { %v713_v57 = vmax.f32 %v539_v56, 0.0  ;;  %v1801_v58 = vpop.f32.mrb[38].mxu0 }
 0x12a   :  { %v554_v60 = vadd.f32 %v1801_v58, %v2280_v7  ;;  %v548_v61 = vpop.f32.mrb[39].mxu0 }
 0x12b   :  { %v549_v62 = vadd.f32 %v2280_v7, %v548_v61  ;;  %1896 = vmatprep.mubr.msk.f32.mxu1 %vm750_vm2, %v713_v57 }
 0x12c   :  { %1897 = vmatmul.mubr.msk.f32.gmra.mrb[36].mxu1 %vm750_vm2, %v714_v59  ;;  %v716_v1 = vmax.f32 %v554_v60, 0.0 }
 0x12d   :  { %v715_v63 = vmax.f32 %v549_v62, 0.0  ;;  %v1804_v0 = vpop.f32.mrb[40].mxu0 }
 0x12e   :  { %v564_v2 = vadd.f32 %v1804_v0, %v2280_v7  ;;  %v558_v3 = vpop.f32.mrb[41].mxu0 }
 0x12f   :  { %v559_v4 = vadd.f32 %v2280_v7, %v558_v3  ;;  %1899 = vmatprep.mubr.msk.f32.mxu1 %vm750_vm2, %v715_v63 }
 0x130   :  { %1900 = vmatmul.mubr.msk.f32.gmra.mrb[38].mxu1 %vm750_vm2, %v716_v1  ;;  %v718_v8 = vmax.f32 %v564_v2, 0.0 }
 0x131   :  { %v717_v5 = vmax.f32 %v559_v4, 0.0  ;;  %v1807_v6 = vpop.f32.mrb[42].mxu0 }
 0x132   :  { %v574_v9 = vadd.f32 %v1807_v6, %v2280_v7  ;;  %v568_v10 = vpop.f32.mrb[43].mxu0 }
 0x133   :  { %v569_v11 = vadd.f32 %v2280_v7, %v568_v10  ;;  %1902 = vmatprep.mubr.msk.f32.mxu1 %vm750_vm2, %v717_v5 }
 0x134   :  { %1903 = vmatmul.mubr.msk.f32.gmra.mrb[40].mxu1 %vm750_vm2, %v718_v8  ;;  %v720_v14 = vmax.f32 %v574_v9, 0.0 }
 0x135   :  { %v719_v12 = vmax.f32 %v569_v11, 0.0  ;;  %v1810_v13 = vpop.f32.mrb[44].mxu0 }
 0x136   :  { %v584_v15 = vadd.f32 %v1810_v13, %v2280_v7  ;;  %v578_v16 = vpop.f32.mrb[45].mxu0 }
 0x137   :  { %v579_v17 = vadd.f32 %v2280_v7, %v578_v16  ;;  %1905 = vmatprep.mubr.msk.f32.mxu1 %vm750_vm2, %v719_v12 }
 0x138   :  { %1906 = vmatmul.mubr.msk.f32.gmra.mrb[42].mxu1 %vm750_vm2, %v720_v14  ;;  %v722_v20 = vmax.f32 %v584_v15, 0.0 }
 0x139   :  { %v721_v18 = vmax.f32 %v579_v17, 0.0  ;;  %v1813_v19 = vpop.f32.mrb[46].mxu0 }
 0x13a   :  { %v594_v21 = vadd.f32 %v1813_v19, %v2280_v7  ;;  %v588_v22 = vpop.f32.mrb[47].mxu0 }
 0x13b   :  { %v589_v23 = vadd.f32 %v2280_v7, %v588_v22  ;;  %1908 = vmatprep.mubr.msk.f32.mxu1 %vm750_vm2, %v721_v18 }
 0x13c   :  { %1909 = vmatmul.mubr.msk.f32.gmra.mrb[44].mxu1 %vm750_vm2, %v722_v20  ;;  %v724_v26 = vmax.f32 %v594_v21, 0.0 }
 0x13d   :  { %v723_v24 = vmax.f32 %v589_v23, 0.0  ;;  %v1816_v25 = vpop.f32.mrb[48].mxu0 }
 0x13e   :  { %v604_v27 = vadd.f32 %v1816_v25, %v2280_v7  ;;  %v598_v28 = vpop.f32.mrb[49].mxu0 }
 0x13f   :  { %v599_v29 = vadd.f32 %v2280_v7, %v598_v28  ;;  %1911 = vmatprep.mubr.msk.f32.mxu1 %vm750_vm2, %v723_v24 }
 0x140   :  { %1912 = vmatmul.mubr.msk.f32.gmra.mrb[46].mxu1 %vm750_vm2, %v724_v26  ;;  %v726_v32 = vmax.f32 %v604_v27, 0.0 }
 0x141   :  { %v725_v30 = vmax.f32 %v599_v29, 0.0  ;;  %v1819_v31 = vpop.f32.mrb[50].mxu0 }
 0x142   :  { %v614_v33 = vadd.f32 %v1819_v31, %v2280_v7  ;;  %v608_v34 = vpop.f32.mrb[51].mxu0 }
 0x143   :  { %v609_v35 = vadd.f32 %v2280_v7, %v608_v34  ;;  %1914 = vmatprep.mubr.msk.f32.mxu1 %vm750_vm2, %v725_v30 }
 0x144   :  { %1915 = vmatmul.mubr.msk.f32.gmra.mrb[48].mxu1 %vm750_vm2, %v726_v32  ;;  %v728_v38 = vmax.f32 %v614_v33, 0.0 }
 0x145   :  { %v727_v36 = vmax.f32 %v609_v35, 0.0  ;;  %v1822_v37 = vpop.f32.mrb[52].mxu0 }
 0x146   :  { %v624_v39 = vadd.f32 %v1822_v37, %v2280_v7  ;;  %v618_v40 = vpop.f32.mrb[53].mxu0 }
 0x147   :  { %v619_v41 = vadd.f32 %v2280_v7, %v618_v40  ;;  %1917 = vmatprep.mubr.msk.f32.mxu1 %vm750_vm2, %v727_v36 }
 0x148   :  { %1918 = vmatmul.mubr.msk.f32.gmra.mrb[50].mxu1 %vm750_vm2, %v728_v38  ;;  %v730_v44 = vmax.f32 %v624_v39, 0.0 }
 0x149   :  { %v729_v42 = vmax.f32 %v619_v41, 0.0  ;;  %v1825_v43 = vpop.f32.mrb[54].mxu0 }
 0x14a   :  { %v634_v45 = vadd.f32 %v1825_v43, %v2280_v7  ;;  %v628_v46 = vpop.f32.mrb[55].mxu0 }
 0x14b   :  { %v629_v47 = vadd.f32 %v2280_v7, %v628_v46  ;;  %1920 = vmatprep.mubr.msk.f32.mxu1 %vm750_vm2, %v729_v42 }
 0x14c   :  { %1921 = vmatmul.mubr.msk.f32.gmra.mrb[52].mxu1 %vm750_vm2, %v730_v44  ;;  %v732_v50 = vmax.f32 %v634_v45, 0.0 }
 0x14d   :  { %v731_v48 = vmax.f32 %v629_v47, 0.0  ;;  %v1828_v49 = vpop.f32.mrb[56].mxu0 }
 0x14e   :  { %v644_v51 = vadd.f32 %v1828_v49, %v2280_v7  ;;  %v638_v52 = vpop.f32.mrb[57].mxu0 }
 0x14f   :  { %v639_v53 = vadd.f32 %v2280_v7, %v638_v52  ;;  %1923 = vmatprep.mubr.msk.f32.mxu1 %vm750_vm2, %v731_v48 }
 0x150   :  { %1924 = vmatmul.mubr.msk.f32.gmra.mrb[54].mxu1 %vm750_vm2, %v732_v50  ;;  %v734_v56 = vmax.f32 %v644_v51, 0.0 }
 0x151   :  { %v733_v54 = vmax.f32 %v639_v53, 0.0  ;;  %v1831_v55 = vpop.f32.mrb[58].mxu0 }
 0x152   :  { %v654_v57 = vadd.f32 %v1831_v55, %v2280_v7  ;;  %v648_v58 = vpop.f32.mrb[59].mxu0 }
 0x153   :  { %v649_v59 = vadd.f32 %v2280_v7, %v648_v58  ;;  %1926 = vmatprep.mubr.msk.f32.mxu1 %vm750_vm2, %v733_v54 }
 0x154   :  { %1927 = vmatmul.mubr.msk.f32.gmra.mrb[56].mxu1 %vm750_vm2, %v734_v56  ;;  %v736_v62 = vmax.f32 %v654_v57, 0.0 }
 0x155   :  { %v735_v60 = vmax.f32 %v649_v59, 0.0  ;;  %v1834_v61 = vpop.f32.mrb[60].mxu0 }
 0x156   :  { %v664_v63 = vadd.f32 %v1834_v61, %v2280_v7  ;;  %v658_v0 = vpop.f32.mrb[61].mxu0 }
 0x157   :  { %v659_v1 = vadd.f32 %v2280_v7, %v658_v0  ;;  %1929 = vmatprep.mubr.msk.f32.mxu1 %vm750_vm2, %v735_v60 }
 0x158   :  { %1930 = vmatmul.mubr.msk.f32.gmra.mrb[58].mxu1 %vm750_vm2, %v736_v62  ;;  %v738_v4 = vmax.f32 %v664_v63, 0.0 }
 0x159   :  { %v737_v2 = vmax.f32 %v659_v1, 0.0  ;;  %v1837_v3 = vpop.f32.mrb[62].mxu0 }
 0x15a   :  { %v674_v5 = vadd.f32 %v1837_v3, %v2280_v7  ;;  %v668_v6 = vpop.f32.mrb[63].mxu0 }
 0x15b   :  { %v669_v8 = vadd.f32 %v2280_v7, %v668_v6  ;;  %1932 = vmatprep.mubr.msk.f32.mxu1 %vm750_vm2, %v737_v2  ;;  %v2413_v7 = vld [vmem:[%s2495_s4] ss:$0 sm:$0xff]  ;;  %s1973_s4 = smov [#allocation2]  }
 0x15c   :  { %1933 = vmatmul.mubr.msk.f32.gmra.mrb[60].mxu1 %vm750_vm2, %v738_v4  ;;  %v740_v10 = vmax.f32 %v674_v5, 0.0  ;;  %s1461_s26 = sshll.u32 %s1973_s4, 4  ;;  %s1462_s26 = int_to_ptr.vmem [resolvable:$true] %s1461_s26 }
 0x15d   :  { %v739_v9 = vmax.f32 %v669_v8, 0.0  ;;  %s1949_s27 = scalar_lea.vmem %s1462_s26, 1024  ;;  %p1954_p1 = scmp.lt.s32.totalorder %s1462_s26, %s1462_s26 }
 0x15e   :  { %p1950_p0 = scmp.ne.s32.totalorder %s1462_s26, %s1949_s27  ;;  %p1955_p2 = scmp.lt.s32.totalorder %s1949_s27, %s1949_s27 }
 0x15f   :  { %1935 = vmatprep.mubr.msk.f32.mxu1 %vm750_vm2, %v739_v9 }
 0x160   :  { %1936 = vmatmul.mubr.msk.f32.gmra.mrb[62].mxu1 %vm750_vm2, %v740_v10  ;;  %p1956_p3 = por %p1955_p2, %p1954_p1 }
 0x162   :  { %p1957_p4 = pnand %p1956_p3, %p1950_p0 }
 0x1b7   :  { %v1844_v11 = vpop.f32.mrb[0].mxu1 }
 0x1b8   :  { %v1009_v12 = vpop.f32.mrb[1].mxu1  ;;  %v1015_v19 = vadd.f32 %v1844_v11, %v2413_v7 }
 0x1b9   :  { %v1010_v20 = vadd.f32 %v2413_v7, %v1009_v12 }
 0x1ba   :  { %v1329_v25 = vmax.f32 %v1015_v19, 0.0 }
 0x1bb   :  { %v1847_v13 = vpop.f32.mrb[2].mxu1  ;;  %v1328_v28 = vmax.f32 %v1010_v20, 0.0 }
 0x1bc   :  { %v1019_v14 = vpop.f32.mrb[3].mxu1  ;;  %v1025_v26 = vadd.f32 %v1847_v13, %v2413_v7 }
 0x1bd   :  { %v1020_v29 = vadd.f32 %v2413_v7, %v1019_v14 }
 0x1be   :  { %v1331_v37 = vmax.f32 %v1025_v26, 0.0 }
 0x1bf   :  { %v1850_v15 = vpop.f32.mrb[4].mxu1  ;;  %v1330_v40 = vmax.f32 %v1020_v29, 0.0 }
 0x1c0   :  { %v1029_v16 = vpop.f32.mrb[5].mxu1  ;;  %v1035_v38 = vadd.f32 %v1850_v15, %v2413_v7 }
 0x1c1   :  { %v1030_v41 = vadd.f32 %v2413_v7, %v1029_v16 }
 0x1c2   :  { %v1333_v49 = vmax.f32 %v1035_v38, 0.0 }
 0x1c3   :  { %v1853_v17 = vpop.f32.mrb[6].mxu1  ;;  %v1332_v52 = vmax.f32 %v1030_v41, 0.0 }
 0x1c4   :  { %v1039_v18 = vpop.f32.mrb[7].mxu1  ;;  %v1045_v50 = vadd.f32 %v1853_v17, %v2413_v7 }
 0x1c5   :  { %v1040_v53 = vadd.f32 %v2413_v7, %v1039_v18 }
 0x1c6   :  { %v1335_v61 = vmax.f32 %v1045_v50, 0.0 }
 0x1c7   :  { %v1856_v21 = vpop.f32.mrb[8].mxu1  ;;  %v1334_v63 = vmax.f32 %v1040_v53, 0.0 }
 0x1c8   :  { %v1055_v22 = vadd.f32 %v1856_v21, %v2413_v7  ;;  %v1049_v23 = vpop.f32.mrb[9].mxu1 }
 0x1c9   :  { %v1050_v24 = vadd.f32 %v2413_v7, %v1049_v23 }
 0x1ca   :  { %v1337_v27 = vmax.f32 %v1055_v22, 0.0 }
 0x1cb   :  { %v1336_v30 = vmax.f32 %v1050_v24, 0.0  ;;  %v1859_v31 = vpop.f32.mrb[10].mxu1 }
 0x1cc   :  { %v1399_v32 = vmax.f32 %v1329_v25, %v1337_v27  ;;  %v1065_v33 = vadd.f32 %v1859_v31, %v2413_v7  ;;  %v1059_v34 = vpop.f32.mrb[11].mxu1 }
 0x1cd   :  { %v1392_v35 = vmax.f32 %v1328_v28, %v1336_v30  ;;  %v1060_v36 = vadd.f32 %v2413_v7, %v1059_v34 }
 0x1ce   :  { %v1339_v39 = vmax.f32 %v1065_v33, 0.0 }
 0x1cf   :  { %v1338_v42 = vmax.f32 %v1060_v36, 0.0  ;;  %v1862_v43 = vpop.f32.mrb[12].mxu1 }
 0x1d0   :  { %v1413_v44 = vmax.f32 %v1331_v37, %v1339_v39  ;;  %v1075_v45 = vadd.f32 %v1862_v43, %v2413_v7  ;;  %v1069_v46 = vpop.f32.mrb[13].mxu1 }
 0x1d1   :  { %v1406_v47 = vmax.f32 %v1330_v40, %v1338_v42  ;;  %v1070_v48 = vadd.f32 %v2413_v7, %v1069_v46 }
 0x1d2   :  { %v1341_v51 = vmax.f32 %v1075_v45, 0.0 }
 0x1d3   :  { %v1340_v54 = vmax.f32 %v1070_v48, 0.0  ;;  %v1865_v55 = vpop.f32.mrb[14].mxu1 }
 0x1d4   :  { %v1427_v56 = vmax.f32 %v1333_v49, %v1341_v51  ;;  %v1085_v57 = vadd.f32 %v1865_v55, %v2413_v7  ;;  %v1079_v58 = vpop.f32.mrb[15].mxu1 }
 0x1d5   :  { %v1420_v59 = vmax.f32 %v1332_v52, %v1340_v54  ;;  %v1080_v60 = vadd.f32 %v2413_v7, %v1079_v58 }
 0x1d6   :  { %v1343_v62 = vmax.f32 %v1085_v57, 0.0 }
 0x1d7   :  { %v1342_v0 = vmax.f32 %v1080_v60, 0.0  ;;  %v1868_v1 = vpop.f32.mrb[16].mxu1 }
 0x1d8   :  { %v1441_v2 = vmax.f32 %v1335_v61, %v1343_v62  ;;  %v1095_v3 = vadd.f32 %v1868_v1, %v2413_v7  ;;  %v1089_v4 = vpop.f32.mrb[17].mxu1 }
 0x1d9   :  { %v1434_v5 = vmax.f32 %v1334_v63, %v1342_v0  ;;  %v1090_v6 = vadd.f32 %v2413_v7, %v1089_v4 }
 0x1da   :  { %v1345_v8 = vmax.f32 %v1095_v3, 0.0 }
 0x1db   :  { %v1344_v9 = vmax.f32 %v1090_v6, 0.0  ;;  %v1871_v10 = vpop.f32.mrb[18].mxu1 }
 0x1dc   :  { %v1400_v11 = vmax.f32 %v1399_v32, %v1345_v8  ;;  %v1105_v12 = vadd.f32 %v1871_v10, %v2413_v7  ;;  %v1099_v13 = vpop.f32.mrb[19].mxu1 }
 0x1dd   :  { %v1393_v14 = vmax.f32 %v1392_v35, %v1344_v9  ;;  %v1100_v15 = vadd.f32 %v2413_v7, %v1099_v13 }
 0x1de   :  { %v1347_v16 = vmax.f32 %v1105_v12, 0.0 }
 0x1df   :  { %v1346_v17 = vmax.f32 %v1100_v15, 0.0  ;;  %v1874_v18 = vpop.f32.mrb[20].mxu1 }
 0x1e0   :  { %v1414_v19 = vmax.f32 %v1413_v44, %v1347_v16  ;;  %v1115_v20 = vadd.f32 %v1874_v18, %v2413_v7  ;;  %v1109_v21 = vpop.f32.mrb[21].mxu1 }
 0x1e1   :  { %v1407_v22 = vmax.f32 %v1406_v47, %v1346_v17  ;;  %v1110_v23 = vadd.f32 %v2413_v7, %v1109_v21 }
 0x1e2   :  { %v1349_v24 = vmax.f32 %v1115_v20, 0.0 }
 0x1e3   :  { %v1348_v25 = vmax.f32 %v1110_v23, 0.0  ;;  %v1877_v26 = vpop.f32.mrb[22].mxu1 }
 0x1e4   :  { %v1428_v27 = vmax.f32 %v1427_v56, %v1349_v24  ;;  %v1125_v28 = vadd.f32 %v1877_v26, %v2413_v7  ;;  %v1119_v29 = vpop.f32.mrb[23].mxu1 }
 0x1e5   :  { %v1421_v30 = vmax.f32 %v1420_v59, %v1348_v25  ;;  %v1120_v31 = vadd.f32 %v2413_v7, %v1119_v29 }
 0x1e6   :  { %v1351_v32 = vmax.f32 %v1125_v28, 0.0 }
 0x1e7   :  { %v1350_v33 = vmax.f32 %v1120_v31, 0.0  ;;  %v1880_v34 = vpop.f32.mrb[24].mxu1 }
 0x1e8   :  { %v1442_v35 = vmax.f32 %v1441_v2, %v1351_v32  ;;  %v1135_v36 = vadd.f32 %v1880_v34, %v2413_v7  ;;  %v1129_v37 = vpop.f32.mrb[25].mxu1 }
 0x1e9   :  { %v1435_v38 = vmax.f32 %v1434_v5, %v1350_v33  ;;  %v1130_v39 = vadd.f32 %v2413_v7, %v1129_v37 }
 0x1ea   :  { %v1353_v40 = vmax.f32 %v1135_v36, 0.0 }
 0x1eb   :  { %v1352_v41 = vmax.f32 %v1130_v39, 0.0  ;;  %v1883_v42 = vpop.f32.mrb[26].mxu1 }
 0x1ec   :  { %v1401_v43 = vmax.f32 %v1400_v11, %v1353_v40  ;;  %v1145_v44 = vadd.f32 %v1883_v42, %v2413_v7  ;;  %v1139_v45 = vpop.f32.mrb[27].mxu1 }
 0x1ed   :  { %v1394_v46 = vmax.f32 %v1393_v14, %v1352_v41  ;;  %v1140_v47 = vadd.f32 %v2413_v7, %v1139_v45 }
 0x1ee   :  { %v1355_v48 = vmax.f32 %v1145_v44, 0.0 }
 0x1ef   :  { %v1354_v49 = vmax.f32 %v1140_v47, 0.0  ;;  %v1886_v50 = vpop.f32.mrb[28].mxu1 }
 0x1f0   :  { %v1415_v51 = vmax.f32 %v1414_v19, %v1355_v48  ;;  %v1155_v52 = vadd.f32 %v1886_v50, %v2413_v7  ;;  %v1149_v53 = vpop.f32.mrb[29].mxu1 }
 0x1f1   :  { %v1408_v54 = vmax.f32 %v1407_v22, %v1354_v49  ;;  %v1150_v55 = vadd.f32 %v2413_v7, %v1149_v53 }
 0x1f2   :  { %v1357_v56 = vmax.f32 %v1155_v52, 0.0 }
 0x1f3   :  { %v1356_v57 = vmax.f32 %v1150_v55, 0.0  ;;  %v1889_v58 = vpop.f32.mrb[30].mxu1 }
 0x1f4   :  { %v1429_v59 = vmax.f32 %v1428_v27, %v1357_v56  ;;  %v1165_v60 = vadd.f32 %v1889_v58, %v2413_v7  ;;  %v1159_v61 = vpop.f32.mrb[31].mxu1 }
 0x1f5   :  { %v1422_v62 = vmax.f32 %v1421_v30, %v1356_v57  ;;  %v1160_v63 = vadd.f32 %v2413_v7, %v1159_v61 }
 0x1f6   :  { %v1359_v0 = vmax.f32 %v1165_v60, 0.0 }
 0x1f7   :  { %v1358_v1 = vmax.f32 %v1160_v63, 0.0  ;;  %v1892_v2 = vpop.f32.mrb[32].mxu1 }
 0x1f8   :  { %v1443_v3 = vmax.f32 %v1442_v35, %v1359_v0  ;;  %v1175_v4 = vadd.f32 %v1892_v2, %v2413_v7  ;;  %v1169_v5 = vpop.f32.mrb[33].mxu1 }
 0x1f9   :  { %v1436_v6 = vmax.f32 %v1435_v38, %v1358_v1  ;;  %v1170_v8 = vadd.f32 %v2413_v7, %v1169_v5 }
 0x1fa   :  { %v1361_v9 = vmax.f32 %v1175_v4, 0.0 }
 0x1fb   :  { %v1360_v10 = vmax.f32 %v1170_v8, 0.0  ;;  %v1895_v11 = vpop.f32.mrb[34].mxu1 }
 0x1fc   :  { %v1402_v12 = vmax.f32 %v1401_v43, %v1361_v9  ;;  %v1185_v13 = vadd.f32 %v1895_v11, %v2413_v7  ;;  %v1179_v14 = vpop.f32.mrb[35].mxu1 }
 0x1fd   :  { %v1395_v15 = vmax.f32 %v1394_v46, %v1360_v10  ;;  %v1180_v16 = vadd.f32 %v2413_v7, %v1179_v14 }
 0x1fe   :  { %v1363_v17 = vmax.f32 %v1185_v13, 0.0 }
 0x1ff   :  { %v1362_v18 = vmax.f32 %v1180_v16, 0.0  ;;  %v1898_v19 = vpop.f32.mrb[36].mxu1 }
 0x200   :  { %v1416_v20 = vmax.f32 %v1415_v51, %v1363_v17  ;;  %v1195_v21 = vadd.f32 %v1898_v19, %v2413_v7  ;;  %v1189_v22 = vpop.f32.mrb[37].mxu1 }
 0x201   :  { %v1409_v23 = vmax.f32 %v1408_v54, %v1362_v18  ;;  %v1190_v24 = vadd.f32 %v2413_v7, %v1189_v22 }
 0x202   :  { %v1365_v25 = vmax.f32 %v1195_v21, 0.0 }
 0x203   :  { %v1364_v26 = vmax.f32 %v1190_v24, 0.0  ;;  %v1901_v27 = vpop.f32.mrb[38].mxu1 }
 0x204   :  { %v1430_v28 = vmax.f32 %v1429_v59, %v1365_v25  ;;  %v1205_v29 = vadd.f32 %v1901_v27, %v2413_v7  ;;  %v1199_v30 = vpop.f32.mrb[39].mxu1 }
 0x205   :  { %v1423_v31 = vmax.f32 %v1422_v62, %v1364_v26  ;;  %v1200_v32 = vadd.f32 %v2413_v7, %v1199_v30 }
 0x206   :  { %v1367_v33 = vmax.f32 %v1205_v29, 0.0 }
 0x207   :  { %v1366_v34 = vmax.f32 %v1200_v32, 0.0  ;;  %v1904_v35 = vpop.f32.mrb[40].mxu1 }
 0x208   :  { %v1444_v36 = vmax.f32 %v1443_v3, %v1367_v33  ;;  %v1215_v37 = vadd.f32 %v1904_v35, %v2413_v7  ;;  %v1209_v38 = vpop.f32.mrb[41].mxu1 }
 0x209   :  { %v1437_v39 = vmax.f32 %v1436_v6, %v1366_v34  ;;  %v1210_v40 = vadd.f32 %v2413_v7, %v1209_v38 }
 0x20a   :  { %v1369_v41 = vmax.f32 %v1215_v37, 0.0 }
 0x20b   :  { %v1368_v42 = vmax.f32 %v1210_v40, 0.0  ;;  %v1907_v43 = vpop.f32.mrb[42].mxu1 }
 0x20c   :  { %v1403_v44 = vmax.f32 %v1402_v12, %v1369_v41  ;;  %v1225_v45 = vadd.f32 %v1907_v43, %v2413_v7  ;;  %v1219_v46 = vpop.f32.mrb[43].mxu1 }
 0x20d   :  { %v1396_v47 = vmax.f32 %v1395_v15, %v1368_v42  ;;  %v1220_v48 = vadd.f32 %v2413_v7, %v1219_v46 }
 0x20e   :  { %v1371_v49 = vmax.f32 %v1225_v45, 0.0 }
 0x20f   :  { %v1370_v50 = vmax.f32 %v1220_v48, 0.0  ;;  %v1910_v51 = vpop.f32.mrb[44].mxu1 }
 0x210   :  { %v1417_v52 = vmax.f32 %v1416_v20, %v1371_v49  ;;  %v1235_v53 = vadd.f32 %v1910_v51, %v2413_v7  ;;  %v1229_v54 = vpop.f32.mrb[45].mxu1 }
 0x211   :  { %v1410_v55 = vmax.f32 %v1409_v23, %v1370_v50  ;;  %v1230_v56 = vadd.f32 %v2413_v7, %v1229_v54 }
 0x212   :  { %v1373_v57 = vmax.f32 %v1235_v53, 0.0 }
 0x213   :  { %v1372_v58 = vmax.f32 %v1230_v56, 0.0  ;;  %v1913_v59 = vpop.f32.mrb[46].mxu1 }
 0x214   :  { %v1431_v60 = vmax.f32 %v1430_v28, %v1373_v57  ;;  %v1245_v61 = vadd.f32 %v1913_v59, %v2413_v7  ;;  %v1239_v62 = vpop.f32.mrb[47].mxu1 }
 0x215   :  { %v1424_v63 = vmax.f32 %v1423_v31, %v1372_v58  ;;  %v1240_v0 = vadd.f32 %v2413_v7, %v1239_v62 }
 0x216   :  { %v1375_v1 = vmax.f32 %v1245_v61, 0.0 }
 0x217   :  { %v1374_v2 = vmax.f32 %v1240_v0, 0.0  ;;  %v1916_v3 = vpop.f32.mrb[48].mxu1 }
 0x218   :  { %v1445_v4 = vmax.f32 %v1444_v36, %v1375_v1  ;;  %v1255_v5 = vadd.f32 %v1916_v3, %v2413_v7  ;;  %v1249_v6 = vpop.f32.mrb[49].mxu1 }
 0x219   :  { %v1438_v8 = vmax.f32 %v1437_v39, %v1374_v2  ;;  %v1250_v9 = vadd.f32 %v2413_v7, %v1249_v6 }
 0x21a   :  { %v1377_v10 = vmax.f32 %v1255_v5, 0.0 }
 0x21b   :  { %v1376_v11 = vmax.f32 %v1250_v9, 0.0  ;;  %v1919_v12 = vpop.f32.mrb[50].mxu1 }
 0x21c   :  { %v1404_v13 = vmax.f32 %v1403_v44, %v1377_v10  ;;  %v1265_v14 = vadd.f32 %v1919_v12, %v2413_v7  ;;  %v1259_v15 = vpop.f32.mrb[51].mxu1 }
 0x21d   :  { %v1397_v16 = vmax.f32 %v1396_v47, %v1376_v11  ;;  %v1260_v17 = vadd.f32 %v2413_v7, %v1259_v15 }
 0x21e   :  { %v1379_v18 = vmax.f32 %v1265_v14, 0.0 }
 0x21f   :  { %v1378_v19 = vmax.f32 %v1260_v17, 0.0  ;;  %v1922_v20 = vpop.f32.mrb[52].mxu1 }
 0x220   :  { %v1418_v21 = vmax.f32 %v1417_v52, %v1379_v18  ;;  %v1275_v22 = vadd.f32 %v1922_v20, %v2413_v7  ;;  %v1269_v23 = vpop.f32.mrb[53].mxu1 }
 0x221   :  { %v1411_v24 = vmax.f32 %v1410_v55, %v1378_v19  ;;  %v1270_v25 = vadd.f32 %v2413_v7, %v1269_v23 }
 0x222   :  { %v1381_v26 = vmax.f32 %v1275_v22, 0.0 }
 0x223   :  { %v1380_v27 = vmax.f32 %v1270_v25, 0.0  ;;  %v1925_v28 = vpop.f32.mrb[54].mxu1 }
 0x224   :  { %v1432_v29 = vmax.f32 %v1431_v60, %v1381_v26  ;;  %v1285_v30 = vadd.f32 %v1925_v28, %v2413_v7  ;;  %v1279_v31 = vpop.f32.mrb[55].mxu1 }
 0x225   :  { %v1425_v32 = vmax.f32 %v1424_v63, %v1380_v27  ;;  %v1280_v33 = vadd.f32 %v2413_v7, %v1279_v31 }
 0x226   :  { %v1383_v34 = vmax.f32 %v1285_v30, 0.0 }
 0x227   :  { %v1382_v35 = vmax.f32 %v1280_v33, 0.0  ;;  %v1928_v36 = vpop.f32.mrb[56].mxu1 }
 0x228   :  { %v1446_v37 = vmax.f32 %v1445_v4, %v1383_v34  ;;  %v1295_v38 = vadd.f32 %v1928_v36, %v2413_v7  ;;  %v1289_v39 = vpop.f32.mrb[57].mxu1 }
 0x229   :  { %v1439_v40 = vmax.f32 %v1438_v8, %v1382_v35  ;;  %v1290_v41 = vadd.f32 %v2413_v7, %v1289_v39 }
 0x22a   :  { %v1385_v42 = vmax.f32 %v1295_v38, 0.0 }
 0x22b   :  { %v1384_v43 = vmax.f32 %v1290_v41, 0.0  ;;  %v1931_v44 = vpop.f32.mrb[58].mxu1 }
 0x22c   :  { %v1405_v45 = vmax.f32 %v1404_v13, %v1385_v42  ;;  %v1305_v46 = vadd.f32 %v1931_v44, %v2413_v7  ;;  %v1299_v47 = vpop.f32.mrb[59].mxu1 }
 0x22d   :  { %v1398_v48 = vmax.f32 %v1397_v16, %v1384_v43  ;;  %v1300_v49 = vadd.f32 %v2413_v7, %v1299_v47 }
 0x22e   :  { %1449 = vst [vmem:[#allocation2 + $0x8] sm:$0xff] %v1405_v45  ;;  %v1387_v50 = vmax.f32 %v1305_v46, 0.0 }
 0x22f   :  { %1448 = vst [vmem:[#allocation2] sm:$0xff] %v1398_v48  ;;  %v1386_v51 = vmax.f32 %v1300_v49, 0.0  ;;  %v1934_v52 = vpop.f32.mrb[60].mxu1 }
 0x230   :  { %v1419_v53 = vmax.f32 %v1418_v21, %v1387_v50  ;;  %v1315_v54 = vadd.f32 %v1934_v52, %v2413_v7  ;;  %v1309_v55 = vpop.f32.mrb[61].mxu1 }
 0x231   :  { %v1412_v56 = vmax.f32 %v1411_v24, %v1386_v51  ;;  %v1310_v57 = vadd.f32 %v2413_v7, %v1309_v55 }
 0x232   :  { %1451 = vst [vmem:[#allocation2 + $0x18] sm:$0xff] %v1419_v53  ;;  %v1389_v58 = vmax.f32 %v1315_v54, 0.0 }
 0x233   :  { %1450 = vst [vmem:[#allocation2 + $0x10] sm:$0xff] %v1412_v56  ;;  %v1388_v59 = vmax.f32 %v1310_v57, 0.0  ;;  %v1937_v60 = vpop.f32.mrb[62].mxu1 }
 0x234   :  { %v1433_v61 = vmax.f32 %v1432_v29, %v1389_v58  ;;  %v1325_v62 = vadd.f32 %v1937_v60, %v2413_v7  ;;  %v1319_v63 = vpop.f32.mrb[63].mxu1 }
 0x235   :  { %v1426_v0 = vmax.f32 %v1425_v32, %v1388_v59  ;;  %v1320_v1 = vadd.f32 %v2413_v7, %v1319_v63 }
 0x236   :  { %1453 = vst [vmem:[#allocation2 + $0x28] sm:$0xff] %v1433_v61  ;;  %v1391_v2 = vmax.f32 %v1325_v62, 0.0 }
 0x237   :  { %1452 = vst [vmem:[#allocation2 + $0x20] sm:$0xff] %v1426_v0  ;;  %v1390_v3 = vmax.f32 %v1320_v1, 0.0 }
 0x238   :  { %v1447_v4 = vmax.f32 %v1446_v37, %v1391_v2 }
 0x239   :  { %v1440_v5 = vmax.f32 %v1439_v40, %v1390_v3 }
 0x23a   :  { %1455 = vst [vmem:[#allocation2 + $0x38] sm:$0xff] %v1447_v4 }
 0x23b   :  { %1454 = vst [vmem:[#allocation2 + $0x30] sm:$0xff] %v1440_v5 }
 0x23c   :  { %1960 = shalt.err (!%p1957_p4)
}
 0x23d   :  { %s1961_s1 = scalar_lea.hbm %s2496_s5, 1024 }
 0x23e   :  { %p1962_p5 = scmp.ne.s32.totalorder %s2496_s5, %s1961_s1  ;;  %p1965_p6 = scmp.lt.u32.totalorder %s1961_s1, %s2496_s5 }
 0x240   :  { %p1967_p7 = pnand %p1965_p6, %p1962_p5 }
 0x242   :  { %1970 = shalt.err (!%p1967_p7)
}
 0x243   :  { %s1974_s9 = smov 128   ;;  %s1975_s10 = smov 8  }
 0x244   :  { %1467 = dma.vmem_to_hbm [thread:$0]  %s1462_s26, 1024, %s2496_s5, [#allocation3], %s1974_s9, %s1974_s9, %s1975_s10  }
 0x245   :  { %1971 = dma.done.wait [#allocation3], 1024  }
 0x246   :  { %1972 = vsyncadd [#allocation3], 4294966272 }
 0x247   :  { %1471 = vsyncpa [#allocation3], 1 }

</bundles_post_ra>
